<compile_context>
chip_gen: v6e
topology: v6e:2x2x1
jax: 0.10.0
libtpu: 0.0.40
codegen_flags: <defaults>
</compile_context>

<pallas_src>
import jax
import jax.numpy as jnp
from jax.experimental import pallas as pl
from jax.experimental.pallas import tpu as pltpu

EPS = 1e-5


# ----------------------------- Pallas kernels ------------------------------ #

def _pool_stats_kernel(x_ref, pw_ref, pooled_ref, sum_ref, ssq_ref):
    """Fused 2x2 avg-pool + batch-statistics accumulation on one row-pair tile.

    x_ref:      [rows, 2W]    each row = one channel's (2h, 2h+1) image-row pair
    pw_ref:     [2W, W//2]    structured pool matrix (0.25 entries)
    pooled_ref: [rows, W//2]  pooled activations (native dtype)
    sum_ref:    [rows, 2W]    f32 elementwise sum over the batch axis (resident)
    ssq_ref:    [rows, 2W]    f32 elementwise sum of squares (resident)
    """
    @pl.when(pl.program_id(1) == 0)          # first batch sample for this row tile
    def _init():
        sum_ref[...] = jnp.zeros_like(sum_ref)
        ssq_ref[...] = jnp.zeros_like(ssq_ref)

    x = x_ref[...]                            # native dtype
    xf = x.astype(jnp.float32)
    sum_ref[...] += xf                        # VPU-only accumulation; the cross-lane
    ssq_ref[...] += xf * xf                   # reduce happens once in the wrapper.

    # 2x2 avg-pool of a row pair == one tiny rank-2 matmul over the last dim.
    pooled = jnp.dot(x, pw_ref[...], preferred_element_type=jnp.float32)
    pooled_ref[...] = pooled.astype(pooled_ref.dtype)


def _conv_kernel(p_ref, w_ref, b_ref, o_ref):
    """Folded-BN 1x1 conv on pooled activations (spatial flattened on lanes).

    p_ref: [C, tile_s]   pooled activations (native dtype)
    w_ref: [C_out, C]    conv weight with BN scale folded in (native dtype)
    b_ref: [C_out, 1]    BN shift folded through the conv (f32)
    o_ref: [C_out, tile_s]
    """
    y = jnp.dot(w_ref[...], p_ref[...], preferred_element_type=jnp.float32)
    o_ref[...] = (y + b_ref[...]).astype(o_ref.dtype)


# --------------------------- Tiling / VMEM budget --------------------------- #

def _pad_to(n, m):
    return ((n + m - 1) // m) * m


def _vmem_budget():
    """(block budget, explicit vmem_limit_bytes), derived from the chip's VMEM."""
    cap = 64 << 20                             # conservative default (v7x physical)
    try:
        info = pltpu.get_tpu_info()
        cap_attr = getattr(info, "vmem_capacity_bytes", None)
        if cap_attr:
            cap = int(cap_attr)
    except Exception:
        pass
    limit = min((cap * 3) // 4, 96 << 20)      # headroom for compiler internals
    return limit // 2, limit                   # pipelined blocks target <= limit/2


def _choose_tile_rows(total_rows, W, xbytes, budget):
    """Pass-1 row-tile: accounts for x (x2 buffers), pooled (x2), sum+ssq (f32)."""
    lanes_in = _pad_to(2 * W, 128)
    lanes_out = _pad_to(W // 2, 128)
    per_row = (2 * lanes_in * xbytes          # x block, double buffered
               + 2 * lanes_out * xbytes       # pooled block, double buffered
               + 4 * lanes_in * 4)            # sum + ssq f32 accumulators (x2 safety)
    rows_max = max(8, budget // per_row)
    cands = [total_rows] + [d for d in range(8, total_rows, 8)
                            if total_rows % d == 0]
    fitting = [d for d in cands if d <= rows_max]
    return max(fitting) if fitting else min(cands)


def _choose_tile_cols(S, C, C_out, xbytes, budget):
    """Pass-2 spatial tile (lane dim): pooled (x2 buffers) + out (x2 buffers)."""
    per_col = 2 * (_pad_to(C, 8) + _pad_to(C_out, 8)) * xbytes
    col_max = max(128, budget // max(per_col, 1))
    cands = [S] + [d for d in range(128, S, 128) if S % d == 0]
    fitting = [d for d in cands if d <= col_max]
    return max(fitting) if fitting else min(cands)


def _make_pool_matrix(W, dtype):
    """[2W, W//2] matrix: 0.25 at rows {2w, 2w+1, W+2w, W+2w+1} of column w."""
    j = jnp.arange(2 * W)
    col_of_j = (j % W) // 2
    cols = jnp.arange(W // 2)
    return ((col_of_j[:, None] == cols[None, :]) * 0.25).astype(dtype)


# ------------------------------- Wrapper ----------------------------------- #

@jax.jit
def transition_layer(x_nchw, gamma, beta, conv_w):
    """x_nchw: [N, C, H, W]; conv_w: [C_out, C, 1, 1] (PyTorch layout)."""
    N, C, H, W = x_nchw.shape
    C_out = conv_w.shape[0]
    assert H % 2 == 0 and W % 2 == 0
    H2, W2 = H // 2, W // 2
    RT = C * H2                    # row-pairs per sample
    S2 = H2 * W2                   # pooled spatial size

    xbytes = jnp.dtype(x_nchw.dtype).itemsize
    budget, vmem_limit = _vmem_budget()

    # ---- Pass 1: fused 2x2 avg-pool + batch statistics (single read of x) ----
    # Free contiguous HBM view: row (c*H2 + hh) holds image rows 2hh and 2hh+1.
    x_rows = x_nchw.reshape(N, RT, 2 * W)               # native dtype, no upcast
    pool_mat = _make_pool_matrix(W, x_nchw.dtype)

    tile_rows = _choose_tile_rows(RT, W, xbytes, budget)
    grid1 = (RT // tile_rows, N)                        # rows parallel, batch seq.

    pooled, sums, ssqs = pl.pallas_call(
        _pool_stats_kernel,
        out_shape=(jax.ShapeDtypeStruct((N, RT, W2), x_nchw.dtype),
                   jax.ShapeDtypeStruct((RT, 2 * W), jnp.float32),
                   jax.ShapeDtypeStruct((RT, 2 * W), jnp.float32)),
        grid=grid1,
        in_specs=[
            pl.BlockSpec((None, tile_rows, 2 * W), lambda r, n: (n, r, 0)),
            pl.BlockSpec((2 * W, W2), lambda r, n: (0, 0)),
        ],
        out_specs=(
            pl.BlockSpec((None, tile_rows, W2), lambda r, n: (n, r, 0)),
            pl.BlockSpec((tile_rows, 2 * W), lambda r, n: (r, 0)),
            pl.BlockSpec((tile_rows, 2 * W), lambda r, n: (r, 0)),
        ),
        compiler_params=pltpu.CompilerParams(
            dimension_semantics=("parallel", "arbitrary"),
            vmem_limit_bytes=vmem_limit),
    )(x_rows, pool_mat)

    # ---- Fold train-mode BatchNorm into the 1x1 conv (tiny, plain XLA) ----
    cnt = float(N * H * W)
    ssum_c = sums.reshape(C, H2 * 2 * W).sum(axis=1)     # [C]
    ssq_c = ssqs.reshape(C, H2 * 2 * W).sum(axis=1)      # [C]
    mean = ssum_c / cnt
    # TODO(synk): E[x^2]-mean^2 in f32 can cancel for very large-mean inputs.
    var = jnp.maximum(ssq_c / cnt - mean * mean, 0.0)    # biased batch variance
    inv_std = jax.lax.rsqrt(var + EPS)
    scale = gamma.astype(jnp.float32) * inv_std          # [C]
    shift = beta.astype(jnp.float32) - mean * scale      # [C]
    wc = conv_w[:, :, 0, 0].astype(jnp.float32)          # [C_out, C]
    w_fold = (wc * scale[None, :]).astype(x_nchw.dtype)  # BN scale folded into W
    b_fold = (wc @ shift).reshape(C_out, 1)              # BN shift folded through W

    # ---- Pass 2: folded-BN 1x1 conv on pooled tensor (lane-dense output) ----
    pooled_cs = pooled.reshape(N, C, S2)                 # free contiguous reshape
    tile_s = _choose_tile_cols(S2, C, C_out, xbytes, budget)
    grid2 = (N, S2 // tile_s)

    out = pl.pallas_call(
        _conv_kernel,
        out_shape=jax.ShapeDtypeStruct((N, C_out, S2), x_nchw.dtype),
        grid=grid2,
        in_specs=[
            pl.BlockSpec((None, C, tile_s), lambda n, s: (n, 0, s)),
            pl.BlockSpec((C_out, C), lambda n, s: (0, 0)),
            pl.BlockSpec((C_out, 1), lambda n, s: (0, 0)),
        ],
        out_specs=pl.BlockSpec((None, C_out, tile_s), lambda n, s: (n, 0, s)),
        compiler_params=pltpu.CompilerParams(
            dimension_semantics=("parallel", "parallel"),
            vmem_limit_bytes=vmem_limit),
    )(pooled_cs, w_fold, b_fold)

    return out.reshape(N, C_out, H2, W2)


# ------------------------------ Reference ----------------------------------- #

def _reference(x, gamma, beta, conv_w):
    mean = x.mean(axis=(0, 2, 3), keepdims=True)
    var = ((x - mean) ** 2).mean(axis=(0, 2, 3), keepdims=True)
    xb = (x - mean) / jnp.sqrt(var + EPS)
    xb = xb * gamma.reshape(1, -1, 1, 1) + beta.reshape(1, -1, 1, 1)
    y = jnp.einsum('nchw,oc->nohw', xb, conv_w[:, :, 0, 0])
    n, o, h, w = y.shape
    return y.reshape(n, o, h // 2, 2, w // 2, 2).mean(axis=(3, 5))


if __name__ == "__main__":
    key = jax.random.PRNGKey(0)
    k1, k2, k3, k4 = jax.random.split(key, 4)

    N, C, H, W = 2, 4, 16, 16
    compression_factor = 0.5
    C_out = int(C * compression_factor)

    x = jax.random.normal(k1, (N, C, H, W), jnp.float32)
    # Deterministic synthetic parameters (BatchNorm2d affine + 1x1 conv, bias=False).
    gamma = 1.0 + 0.1 * jax.random.normal(k2, (C,), jnp.float32)
    beta = 0.1 * jax.random.normal(k3, (C,), jnp.float32)
    bound = (1.0 / C) ** 0.5
    conv_w = jax.random.uniform(k4, (C_out, C, 1, 1), jnp.float32, -bound, bound)

    out = transition_layer(x, gamma, beta, conv_w)
    out = jax.block_until_ready(out)

    ref = _reference(x, gamma, beta, conv_w)
    assert out.shape == (N, C_out, H // 2, W // 2), out.shape
    err = float(jnp.max(jnp.abs(out - ref)))
    assert jnp.allclose(out, ref, atol=1e-3, rtol=1e-3), err

    print("KERNEL_OK")
</pallas_src>

<mosaic_0001>
module attributes {stable_mosaic.version = 11 : i64} {
  func.func @_pool_stats_kernel(%arg0: i32, %arg1: i32, %arg2: memref<1x32x32xf32, #tpu.memory_space<vmem>>, %arg3: memref<32x8xf32, #tpu.memory_space<vmem>>, %arg4: memref<1x32x8xf32, #tpu.memory_space<vmem>>, %arg5: memref<32x32xf32, #tpu.memory_space<vmem>>, %arg6: memref<32x32xf32, #tpu.memory_space<vmem>>) attributes {dimension_semantics = [#tpu.dimension_semantics<parallel>, #tpu.dimension_semantics<arbitrary>], iteration_bounds = array<i64: 1, 2>, scalar_prefetch = 0 : i64, scratch_operands = 0 : i64, tpu.core_type = #tpu.core_type<tc>, window_params = [{transform_indices = @transform_0, window_bounds = array<i64: 1, 32, 32>}, {pipeline_mode = #tpu.pipeline_mode<synchronous>, transform_indices = @transform_1, window_bounds = array<i64: 32, 8>}, {transform_indices = @transform_2, window_bounds = array<i64: 1, 32, 8>}, {transform_indices = @transform_3, window_bounds = array<i64: 32, 32>}, {transform_indices = @transform_4, window_bounds = array<i64: 32, 32>}]} {
    %c0_i32 = arith.constant 0 : i32
    %0 = arith.cmpi eq, %arg1, %c0_i32 : i32
    %1 = arith.extui %0 : i1 to i32
    %c0_i32_0 = arith.constant 0 : i32
    %2 = arith.cmpi ne, %1, %c0_i32_0 : i32
    scf.if %2 {
      %cst_16 = arith.constant 0.000000e+00 : f32
      %17 = vector.broadcast %cst_16 : f32 to vector<32x32xf32>
      %c0_17 = arith.constant 0 : index
      %c0_18 = arith.constant 0 : index
      %18 = vector.load %arg5[%c0_17, %c0_18] : memref<32x32xf32, #tpu.memory_space<vmem>>, vector<32x32xf32>
      tpu.vector_store %arg5[%c0_17, %c0_18], %17 {strides = array<i32>} : memref<32x32xf32, #tpu.memory_space<vmem>>, vector<32x32xf32>,
      %cst_19 = arith.constant 0.000000e+00 : f32
      %19 = vector.broadcast %cst_19 : f32 to vector<32x32xf32>
      %c0_20 = arith.constant 0 : index
      %c0_21 = arith.constant 0 : index
      %20 = vector.load %arg6[%c0_20, %c0_21] : memref<32x32xf32, #tpu.memory_space<vmem>>, vector<32x32xf32>
      tpu.vector_store %arg6[%c0_20, %c0_21], %19 {strides = array<i32>} : memref<32x32xf32, #tpu.memory_space<vmem>>, vector<32x32xf32>,
    } else {
    }
    %c0 = arith.constant 0 : index
    %c0_1 = arith.constant 0 : index
    %c0_2 = arith.constant 0 : index
    %3 = vector.load %arg2[%c0, %c0_1, %c0_2] : memref<1x32x32xf32, #tpu.memory_space<vmem>>, vector<1x32x32xf32>
    %4 = vector.shape_cast %3 : vector<1x32x32xf32> to vector<32x32xf32>
    %c0_3 = arith.constant 0 : index
    %c0_4 = arith.constant 0 : index
    %5 = vector.load %arg5[%c0_3, %c0_4] : memref<32x32xf32, #tpu.memory_space<vmem>>, vector<32x32xf32>
    %6 = arith.addf %5, %4 : vector<32x32xf32>
    %c0_5 = arith.constant 0 : index
    %c0_6 = arith.constant 0 : index
    %7 = vector.load %arg5[%c0_5, %c0_6] : memref<32x32xf32, #tpu.memory_space<vmem>>, vector<32x32xf32>
    tpu.vector_store %arg5[%c0_5, %c0_6], %6 {strides = array<i32>} : memref<32x32xf32, #tpu.memory_space<vmem>>, vector<32x32xf32>,
    %c0_7 = arith.constant 0 : index
    %c0_8 = arith.constant 0 : index
    %8 = vector.load %arg6[%c0_7, %c0_8] : memref<32x32xf32, #tpu.memory_space<vmem>>, vector<32x32xf32>
    %9 = arith.mulf %4, %4 : vector<32x32xf32>
    %10 = arith.addf %8, %9 : vector<32x32xf32>
    %c0_9 = arith.constant 0 : index
    %c0_10 = arith.constant 0 : index
    %11 = vector.load %arg6[%c0_9, %c0_10] : memref<32x32xf32, #tpu.memory_space<vmem>>, vector<32x32xf32>
    tpu.vector_store %arg6[%c0_9, %c0_10], %10 {strides = array<i32>} : memref<32x32xf32, #tpu.memory_space<vmem>>, vector<32x32xf32>,
    %c0_11 = arith.constant 0 : index
    %c0_12 = arith.constant 0 : index
    %12 = vector.load %arg3[%c0_11, %c0_12] : memref<32x8xf32, #tpu.memory_space<vmem>>, vector<32x8xf32>
    %cst = arith.constant dense<0.000000e+00> : vector<32x8xf32>
    %13 = tpu.matmul %4, %12, %cst {dimension_numbers = #tpu.dot_dimension_numbers<[1], [0], [0], [1], [0, 0, 1, 1], [], []>} : vector<32x32xf32>, vector<32x8xf32>, vector<32x8xf32> -> vector<32x8xf32>
    %c0_13 = arith.constant 0 : index
    %c0_14 = arith.constant 0 : index
    %c0_15 = arith.constant 0 : index
    %14 = vector.load %arg4[%c0_13, %c0_14, %c0_15] : memref<1x32x8xf32, #tpu.memory_space<vmem>>, vector<1x32x8xf32>
    %15 = vector.shape_cast %14 : vector<1x32x8xf32> to vector<32x8xf32>
    %16 = vector.shape_cast %13 : vector<32x8xf32> to vector<1x32x8xf32>
    tpu.vector_store %arg4[%c0_13, %c0_14, %c0_15], %16 {strides = array<i32>} : memref<1x32x8xf32, #tpu.memory_space<vmem>>, vector<1x32x8xf32>,
    return
  }
  func.func @transform_0(%arg0: i32, %arg1: i32) -> (i32, i32, i32) {
    %c0_i32 = arith.constant 0 : i32
    %c0_i32_0 = arith.constant 0 : i32
    return %arg1, %arg0, %c0_i32 : i32, i32, i32
  }
  func.func @transform_1(%arg0: i32, %arg1: i32) -> (i32, i32) {
    %c0_i32 = arith.constant 0 : i32
    %c0_i32_0 = arith.constant 0 : i32
    %c0_i32_1 = arith.constant 0 : i32
    return %c0_i32, %c0_i32_0 : i32, i32
  }
  func.func @transform_2(%arg0: i32, %arg1: i32) -> (i32, i32, i32) {
    %c0_i32 = arith.constant 0 : i32
    %c0_i32_0 = arith.constant 0 : i32
    return %arg1, %arg0, %c0_i32 : i32, i32, i32
  }
  func.func @transform_3(%arg0: i32, %arg1: i32) -> (i32, i32) {
    %c0_i32 = arith.constant 0 : i32
    %c0_i32_0 = arith.constant 0 : i32
    return %arg0, %c0_i32 : i32, i32
  }
  func.func @transform_4(%arg0: i32, %arg1: i32) -> (i32, i32) {
    %c0_i32 = arith.constant 0 : i32
    %c0_i32_0 = arith.constant 0 : i32
    return %arg0, %c0_i32 : i32, i32
  }
}

module attributes {stable_mosaic.version = 11 : i64} {
  func.func @_conv_kernel(%arg0: i32, %arg1: i32, %arg2: memref<1x4x64xf32, #tpu.memory_space<vmem>>, %arg3: memref<2x4xf32, #tpu.memory_space<vmem>>, %arg4: memref<2x1xf32, #tpu.memory_space<vmem>>, %arg5: memref<1x2x64xf32, #tpu.memory_space<vmem>>) attributes {dimension_semantics = [#tpu.dimension_semantics<parallel>, #tpu.dimension_semantics<parallel>], iteration_bounds = array<i64: 2, 1>, scalar_prefetch = 0 : i64, scratch_operands = 0 : i64, tpu.core_type = #tpu.core_type<tc>, window_params = [{transform_indices = @transform_0, window_bounds = array<i64: 1, 4, 64>}, {pipeline_mode = #tpu.pipeline_mode<synchronous>, transform_indices = @transform_1, window_bounds = array<i64: 2, 4>}, {pipeline_mode = #tpu.pipeline_mode<synchronous>, transform_indices = @transform_2, window_bounds = array<i64: 2, 1>}, {transform_indices = @transform_3, window_bounds = array<i64: 1, 2, 64>}]} {
    %c0 = arith.constant 0 : index
    %c0_0 = arith.constant 0 : index
    %0 = vector.load %arg3[%c0, %c0_0] : memref<2x4xf32, #tpu.memory_space<vmem>>, vector<2x4xf32>
    %c0_1 = arith.constant 0 : index
    %c0_2 = arith.constant 0 : index
    %c0_3 = arith.constant 0 : index
    %1 = vector.load %arg2[%c0_1, %c0_2, %c0_3] : memref<1x4x64xf32, #tpu.memory_space<vmem>>, vector<1x4x64xf32>
    %2 = vector.shape_cast %1 : vector<1x4x64xf32> to vector<4x64xf32>
    %cst = arith.constant dense<0.000000e+00> : vector<2x64xf32>
    %3 = tpu.matmul %0, %2, %cst {dimension_numbers = #tpu.dot_dimension_numbers<[1], [0], [0], [1], [0, 0, 1, 1], [], []>} : vector<2x4xf32>, vector<4x64xf32>, vector<2x64xf32> -> vector<2x64xf32>
    %c0_4 = arith.constant 0 : index
    %c0_5 = arith.constant 0 : index
    %4 = vector.load %arg4[%c0_4, %c0_5] : memref<2x1xf32, #tpu.memory_space<vmem>>, vector<2x1xf32>
    %5 = vector.broadcast %4 : vector<2x1xf32> to vector<2x64xf32>
    %6 = arith.addf %3, %5 : vector<2x64xf32>
    %c0_6 = arith.constant 0 : index
    %c0_7 = arith.constant 0 : index
    %c0_8 = arith.constant 0 : index
    %7 = vector.load %arg5[%c0_6, %c0_7, %c0_8] : memref<1x2x64xf32, #tpu.memory_space<vmem>>, vector<1x2x64xf32>
    %8 = vector.shape_cast %7 : vector<1x2x64xf32> to vector<2x64xf32>
    %9 = vector.shape_cast %6 : vector<2x64xf32> to vector<1x2x64xf32>
    tpu.vector_store %arg5[%c0_6, %c0_7, %c0_8], %9 {strides = array<i32>} : memref<1x2x64xf32, #tpu.memory_space<vmem>>, vector<1x2x64xf32>,
    return
  }
  func.func @transform_0(%arg0: i32, %arg1: i32) -> (i32, i32, i32) {
    %c0_i32 = arith.constant 0 : i32
    %c0_i32_0 = arith.constant 0 : i32
    return %arg0, %c0_i32, %arg1 : i32, i32, i32
  }
  func.func @transform_1(%arg0: i32, %arg1: i32) -> (i32, i32) {
    %c0_i32 = arith.constant 0 : i32
    %c0_i32_0 = arith.constant 0 : i32
    %c0_i32_1 = arith.constant 0 : i32
    return %c0_i32, %c0_i32_0 : i32, i32
  }
  func.func @transform_2(%arg0: i32, %arg1: i32) -> (i32, i32) {
    %c0_i32 = arith.constant 0 : i32
    %c0_i32_0 = arith.constant 0 : i32
    %c0_i32_1 = arith.constant 0 : i32
    return %c0_i32, %c0_i32_0 : i32, i32
  }
  func.func @transform_3(%arg0: i32, %arg1: i32) -> (i32, i32, i32) {
    %c0_i32 = arith.constant 0 : i32
    %c0_i32_0 = arith.constant 0 : i32
    return %arg0, %c0_i32, %arg1 : i32, i32, i32
  }
}

</mosaic_0001>

<bundles_post_ra>
// kernel: transition_layer.2
= control target key start
LH: loop header
LB: loop body
LE: loop exit
PB: predicated region body
PF: predicated region fallthrough
CT: control target
= control target key end

     0   :  { %s692_s15 = smov 0   ;;  %s694_s16 = smov 0   ;;  %s833_s0 = inlined_call_operand.vmem [shape: f32[2,32,32], index: 0, kind: input, shape index: {}]   ;;  %s834_s1 = inlined_call_operand.vmem [shape: f32[32,8], index: 1, kind: input, shape index: {}]   ;;  %s835_s2 = inlined_call_operand.vmem [shape: f32[2,32,8], index: 2, kind: output, shape index: {0}]   ;;  %s836_s3 = inlined_call_operand.vmem [shape: f32[32,32], index: 3, kind: output, shape index: {1}]   ;;  %s837_s4 = inlined_call_operand.vmem [shape: f32[32,32], index: 4, kind: output, shape index: {2}]  }
   0x1   :  { %s696_s17 = smov 0  }
   0x2 LB: > { %s24_s18 = sadd.s32 1, %s660_s16  ;;  %p569_p0 = scmp.ge.s32.totalorder %s664_s17, 1  ;;  %s664_s17 = sphi %s696_s17, %s15_s17   ;;  %s660_s16 = sphi %s694_s16, %s839_s16   ;;  %s656_s15 = sphi %s692_s15, %s838_s15  }
   0x3   : > { %p25_p1 = scmp.ge.s32.totalorder %s24_s18, 2  ;;  %p188_p2 = scmp.lt.s32.totalorder %s664_s17, 3 }
   0x5   : > { %s841_s18 = smov (%p25_p1, %s24_s18), 0  ;;  %p189_p3 = pnand %p569_p0, %p188_p2 }
   0x6   : > { %p233_p4 = scmp.lt.s32.totalorder (!%p189_p3), %s656_s15, 1  ;;  %p574_p5 = scmp.ne.s32.totalorder (!%p189_p3), %s656_s15, 0 }
   0x7   : > { %192 = sbr.rel (%p189_p3) target bundleno = 229 (0xe5), region = 28 }
   0xc   : > { %s234_s19 = scalar_select %p233_p4, %s656_s15, 1 }
   0xd   : > { %267 = sbr.rel (%p574_p5) target bundleno = 23 (0x17), region = 32 }
   0xe   : > { %s585_s20 = sshll.u32 %s234_s19, 5 }
   0xf   : > { %s713_s23 = scalar_lea.vmem %s833_s0, %s585_s20  ;;  %s718_s26 = scalar_lea.vmem %s835_s2, %s585_s20 }
  0x12   : > { %vm268_vm0 = vcmask 261120   ;;  %v666_v0 = vmov 0.0  }
  0x13   : > { %269 = vst.msk [vmem:[%s836_s3] sm:$0xff] %vm268_vm0, %v666_v0  ;;  %270 = vst.msk [vmem:[%s836_s3 + $0x8] sm:$0xff] %vm268_vm0, %v666_v0 }
  0x14   : > { %271 = vst.msk [vmem:[%s836_s3 + $0x10] sm:$0xff] %vm268_vm0, %v666_v0  ;;  %272 = vst.msk [vmem:[%s836_s3 + $0x18] sm:$0xff] %vm268_vm0, %v666_v0 }
  0x15   : > { %273 = vst.msk [vmem:[%s837_s4] sm:$0xff] %vm268_vm0, %v666_v0  ;;  %274 = vst.msk [vmem:[%s837_s4 + $0x8] sm:$0xff] %vm268_vm0, %v666_v0 }
  0x16   : > { %275 = vst.msk [vmem:[%s837_s4 + $0x10] sm:$0xff] %vm268_vm0, %v666_v0  ;;  %276 = vst.msk [vmem:[%s837_s4 + $0x18] sm:$0xff] %vm268_vm0, %v666_v0 }
  0x17 PF: > { %v313_v1 = vld [vmem:[%s834_s1 + $0x18] sm:$0xff]  ;;  %v312_v2 = vld [vmem:[%s834_s1 + $0x10] sm:$0xff]  ;;  %v311_v3 = vld [vmem:[%s834_s1 + $0x8] sm:$0xff]  ;;  %vm289_vm1 = vcmask 261120   ;;  %vm411_vm2 = vcmask 64512  }
  0x18   : > { %595 = vmatprep.subr.mxu0 %v313_v1  ;;  %609 = vmatprep.subr.mxu1 %v313_v1  ;;  %v277_v4 = vld [vmem:[%s713_s23] sm:$0xff]  ;;  %v279_v10 = vld [vmem:[%s713_s23 + $0x10] sm:$0xff]  ;;  %v278_v15 = vld [vmem:[%s713_s23 + $0x8] sm:$0xff] }
  0x19   : > { %596 = vmatpush3.msra.mxu0 %v313_v1  ;;  %613 = vmatpush3.msra.mxu1 %v313_v1  ;;  %v310_v6 = vld [vmem:[%s834_s1] sm:$0xff]  ;;  %v298_v9 = vmul.f32 %v277_v4, %v277_v4  ;;  %v300_v14 = vmul.f32 %v279_v10, %v279_v10  ;;  %v299_v20 = vmul.f32 %v278_v15, %v278_v15  ;;  %v280_v21 = vld [vmem:[%s713_s23 + $0x18] sm:$0xff] }
  0x1a   : > { %v281_v5 = vld [vmem:[%s836_s3] sm:$0xff]  ;;  %597 = vmatprep.subr.mxu0 %v312_v2  ;;  %610 = vmatprep.subr.mxu1 %v312_v2  ;;  %v282_v16 = vld [vmem:[%s836_s3 + $0x8] sm:$0xff]  ;;  %v301_v26 = vmul.f32 %v280_v21, %v280_v21 }
  0x1b   : > { %v285_v7 = vadd.f32 %v281_v5, %v277_v4  ;;  %v283_v11 = vld [vmem:[%s836_s3 + $0x10] sm:$0xff]  ;;  %598 = vmatpush3.msra.mxu0 %v312_v2  ;;  %614 = vmatpush3.msra.mxu1 %v312_v2  ;;  %v286_v18 = vadd.f32 %v282_v16, %v278_v15  ;;  %v284_v22 = vld [vmem:[%s836_s3 + $0x18] sm:$0xff] }
  0x1c   : > { %v294_v8 = vld [vmem:[%s837_s4] sm:$0xff]  ;;  %v287_v12 = vadd.f32 %v283_v11, %v279_v10  ;;  %v295_v19 = vld [vmem:[%s837_s4 + $0x8] sm:$0xff]  ;;  %599 = vmatprep.subr.mxu0 %v311_v3  ;;  %611 = vmatprep.subr.mxu1 %v311_v3  ;;  %v288_v24 = vadd.f32 %v284_v22, %v280_v21 }
  0x1d   : > { %v296_v13 = vld [vmem:[%s837_s4 + $0x10] sm:$0xff]  ;;  %290 = vst.msk [vmem:[%s836_s3] sm:$0xff] %vm289_vm1, %v285_v7  ;;  %v302_v17 = vadd.f32 %v298_v9, %v294_v8  ;;  %v297_v25 = vld [vmem:[%s837_s4 + $0x18] sm:$0xff]  ;;  %600 = vmatpush3.msra.mxu0 %v311_v3  ;;  %615 = vmatpush3.msra.mxu1 %v311_v3  ;;  %291 = vst.msk [vmem:[%s836_s3 + $0x8] sm:$0xff] %vm289_vm1, %v286_v18  ;;  %v303_v27 = vadd.f32 %v299_v20, %v295_v19 }
  0x1e   : > { %292 = vst.msk [vmem:[%s836_s3 + $0x10] sm:$0xff] %vm289_vm1, %v287_v12  ;;  %v304_v23 = vadd.f32 %v300_v14, %v296_v13  ;;  %601 = vmatprep.subr.mxu0 %v310_v6  ;;  %612 = vmatprep.subr.mxu1 %v310_v6  ;;  %293 = vst.msk [vmem:[%s836_s3 + $0x18] sm:$0xff] %vm289_vm1, %v288_v24  ;;  %v305_v28 = vadd.f32 %v301_v26, %v297_v25 }
  0x1f   : > { %306 = vst.msk [vmem:[%s837_s4] sm:$0xff] %vm289_vm1, %v302_v17  ;;  %602 = vmatpush3.msra.mxu0 %v310_v6  ;;  %616 = vmatpush3.msra.mxu1 %v310_v6  ;;  %307 = vst.msk [vmem:[%s837_s4 + $0x8] sm:$0xff] %vm289_vm1, %v303_v27 }
  0x20   : > { %308 = vst.msk [vmem:[%s837_s4 + $0x10] sm:$0xff] %vm289_vm1, %v304_v23  ;;  %603 = vmatprep.mubr.msk.f32.mxu0 %vm289_vm1, %v277_v4  ;;  %606 = vmatprep.mubr.msk.f32.mxu1 %vm289_vm1, %v279_v10  ;;  %309 = vst.msk [vmem:[%s837_s4 + $0x18] sm:$0xff] %vm289_vm1, %v305_v28 }
  0x21   : > { %604 = vmatmul.mubr.msk.f32.vlgmr.msra.gmra.mxu0 %vm289_vm1, %v278_v15  ;;  %607 = vmatmul.mubr.msk.f32.vlgmr.msra.gmra.mxu1 %vm289_vm1, %v280_v21 }
  0xe1   : > { %v605_v29 = vpop.f32.mrf.mxu0  ;;  %v608_v30 = vpop.f32.mrf.mxu1 }
  0xe2   : > { %413 = vst.msk [vmem:[%s718_s26 + $0x8] sm:$0xff] %vm411_vm2, %v605_v29  ;;  %415 = vst.msk [vmem:[%s718_s26 + $0x18] sm:$0xff] %vm411_vm2, %v608_v30 }
  0xe3   : > { %v392_v31 = vpop.f32.mrf.mxu0  ;;  %v402_v32 = vpop.f32.mrf.mxu1 }
  0xe4   : > { %412 = vst.msk [vmem:[%s718_s26] sm:$0xff] %vm411_vm2, %v392_v31  ;;  %414 = vst.msk [vmem:[%s718_s26 + $0x10] sm:$0xff] %vm411_vm2, %v402_v32 }
  0xe5 PF: > { %s15_s17 = sadd.s32 1, %s664_s17   ;;  %s838_s15 = smov %s660_s16 }
  0xe6   : > { %p12_p6 = scmp.ge.s32.totalorder %s15_s17, 4   ;;  %s839_s16 = smov %s841_s18 }
  0xe8   :  { %14 = sbr.rel (!%p12_p6) target bundleno = 2 (0x2), region = 86 }

// kernel: transition_layer.3
= control target key start
LH: loop header
LB: loop body
LE: loop exit
PB: predicated region body
PF: predicated region fallthrough
CT: control target
= control target key end

     0   :  { %s452_s12 = smov 0   ;;  %s454_s13 = smov 0   ;;  %s491_s0 = inlined_call_operand.vmem [shape: f32[2,4,64], index: 0, kind: input, shape index: {}]   ;;  %s492_s1 = inlined_call_operand.vmem [shape: f32[2,4], index: 1, kind: input, shape index: {}]   ;;  %s493_s2 = inlined_call_operand.vmem [shape: f32[2,1], index: 2, kind: input, shape index: {}]   ;;  %s494_s3 = inlined_call_operand.vmem [shape: f32[2,2,64], index: 3, kind: output, shape index: {}]  }
   0x1   :  { %s456_s14 = smov 0  }
   0x2 LB: > { %s25_s15 = sadd.s32 1, %s423_s13  ;;  %p363_p0 = scmp.ge.s32.totalorder %s427_s14, 1  ;;  %s427_s14 = sphi %s456_s14, %s13_s14   ;;  %s423_s13 = sphi %s454_s13, %s496_s13   ;;  %s419_s12 = sphi %s452_s12, %s495_s12  }
   0x3   : > { %p27_p1 = scmp.ge.s32.totalorder %s25_s15, 2  ;;  %p155_p2 = scmp.lt.s32.totalorder %s427_s14, 3 }
   0x5   : > { %s498_s15 = smov (%p27_p1, %s25_s15), 0  ;;  %p156_p3 = pnand %p363_p0, %p155_p2 }
   0x6   : > { %p183_p4 = scmp.lt.s32.totalorder (!%p156_p3), %s419_s12, 1 }
   0x7   : > { %159 = sbr.rel (%p156_p3) target bundleno = 213 (0xd5), region = 32 }
   0xc   : > { %v429_v0 = vmov 0.0   ;;  %vm430_vm0 = vmmov 0   ;;  %v199_v1 = vld [vmem:[%s493_s2] sm:$0x3]  ;;  %s500_s12 = smov (!%p183_p4, %s419_s12), 1  ;;  %v431_v2 = vmov 0  }
   0xd   : > { %372 = vmatprep.subr.mxu0 %v429_v0  ;;  %374 = vmatprep.mubr.msk.f32.mxu0 %vm430_vm0, %v429_v0  ;;  %s364_s18 = sshll.u32 %s500_s12, 2  ;;  %vm209_vm1 = vcmask 1043456   ;;  %v197_v3 = vld [vmem:[%s492_s1] sm:$0x3]  ;;  %vm205_vm2 = vcmask 31744   ;;  %s365_s24 = sshll.u32 %s500_s12, 1 }
   0xe   : > { %404 = vset.pattern.permute.xlu0 %v431_v2  ;;  %s189_s21 = scalar_lea.vmem %s491_s0, %s364_s18  ;;  %s196_s27 = scalar_lea.vmem %s494_s3, %s365_s24  ;;  %vm283_vm3 = vcmask 517120  }
   0xf   : > { %202 = vperm.xlu0 %404, %v199_v1   ;;  %v198_v4 = vld [vmem:[%s189_s21] sm:$0xf] }
  0x10   : > { %373 = vmatpush3.msk.msra.mxu0 %vm209_vm1, %v198_v4 }
  0x11   : > { %375 = vmatmul.mubr.msk.f32.vlgmr.msra.gmra.mxu0 %vm205_vm2, %v197_v3 }
  0x8a   : > { %v203_v5 = vpop.permute.xlu0 %202 }
  0xd1   : > { %v279_v6 = vpop.f32.mrf.mxu0 }
  0xd2   : > { %v280_v7 = vadd.f32 %v279_v6, %v203_v5 }
  0xd3   : > { %v376_v8 = vpop.f32.mrf.mxu0 }
  0xd4   : > { %284 = vst.msk [vmem:[%s196_s27] sm:$0x3] %vm283_vm3, %v280_v7 }
  0xd5 PF: > { %s13_s14 = sadd.s32 1, %s427_s14   ;;  %s495_s12 = smov %s423_s13 }
  0xd6   : > { %p10_p5 = scmp.ge.s32.totalorder %s13_s14, 4   ;;  %s496_s13 = smov %s498_s15 }
  0xd8   :  { %12 = sbr.rel (!%p10_p5) target bundleno = 2 (0x2), region = 62 }

</bundles_post_ra>
